<compile_context>
chip_gen: v7x
topology: tpu7x:2x2x1
jax: 0.10.0
libtpu: 0.0.40
codegen_flags: <defaults>
</compile_context>

<pallas_src>
import jax
import jax.numpy as jnp
from jax.experimental import pallas as pl
from jax.experimental.pallas import tpu as pltpu

# ---- "Config" (small, deterministic, consistent with the module) -------------
VOCAB_NUM = 50
VOCAB_PAD = 64                     # per-tap one-hot width (>= vocab, zero rows above VOCAB_NUM)
EMBED_DIM = 32
KERNEL_DIM = 8                     # out_channels per conv
KERNEL_SIZES = (3, 4, 5)
LABEL_NUM = 4
SEQ_LEN = 16
BATCH = 2
DROPOUT_P = 0.5                    # unused in the inference path below

KMAX = max(KERNEL_SIZES)
KMIN = min(KERNEL_SIZES)
TMAX = SEQ_LEN - KMIN + 1          # longest valid conv output length (14)
C3 = len(KERNEL_SIZES) * KERNEL_DIM            # concatenated feature width (24)
LFOLD = KMAX * VOCAB_PAD           # folded contraction depth (320)
PAD_TOKEN = VOCAB_NUM              # maps to an all-zero row of the folded weight


def textcnn_kernel(tok_ref, convp_ref, fcp_ref, out_ref):
    """tok:(B,TMAX,KMAX) i32 (pre-offset by k*VOCAB_PAD)
       convp:(LFOLD+8, 3C) bf16  -- rows [0:LFOLD) folded emb*conv weight,
                                    row LFOLD = conv bias, row LFOLD+1 = last valid t
       fcp:(3C+8, L) f32         -- rows [0:3C) fc weight, row 3C = fc bias
       out:(B, L) f32."""
    B = out_ref.shape[0]

    # ---- One-hot slab from unfolded tokens (KMAX lane-broadcast compares) ---
    toks = tok_ref[...]                                              # (B, TMAX, KMAX) int32
    iota_l = jax.lax.broadcasted_iota(jnp.int32, (B, TMAX, LFOLD), 2)
    hit = toks[:, :, 0:1] == iota_l                                  # blocks are disjoint,
    for k in range(1, KMAX):                                         # so OR == exact one-hot
        hit = jnp.logical_or(hit, toks[:, :, k:k + 1] == iota_l)
    onehot = hit.astype(jnp.bfloat16)                                # (B, TMAX, 320), exact in bf16

    # ---- Fused embed + im2col + all convs: ONE MXU matmul -------------------
    w_conv = convp_ref[0:LFOLD, :]                                   # (320, 3C) bf16, aligned
    extra = convp_ref[LFOLD:LFOLD + 8, :].astype(jnp.float32)        # (8, 3C), aligned load
    bias = extra[0:1, :].reshape(1, 1, C3)                           # packed conv biases
    tlim = extra[1:2, :].reshape(1, 1, C3)                           # last valid t per column

    conv = jax.lax.dot_general(onehot, w_conv,
                               (((2,), (0,)), ((), ())),
                               preferred_element_type=jnp.float32)   # (B, TMAX, 3C) f32

    # ---- bias + ReLU + validity mask + max-pool ------------------------------
    relu = jnp.maximum(conv + bias, 0.0)
    t_idx = jax.lax.broadcasted_iota(jnp.int32, (B, TMAX, C3), 1).astype(jnp.float32)
    relu = jnp.where(t_idx <= tlim, relu, 0.0)                       # exact: ReLU output >= 0
    feat = jnp.max(relu, axis=1)                                     # (B, 3C), already "concatenated"

    # TODO(synk): training-mode dropout omitted (inference path); would use pltpu.prng_*.

    # ---- FC + softmax (exact divide; cost negligible) ------------------------
    fcw = fcp_ref[0:C3, :]                                           # (3C, L) f32
    fcb = fcp_ref[C3:C3 + 1, :]                                      # (1, L)
    logits = jnp.dot(feat, fcw, preferred_element_type=jnp.float32) + fcb
    m = jnp.max(logits, axis=1, keepdims=True)
    e = jnp.exp(logits - m)
    out_ref[...] = (e / jnp.sum(e, axis=1, keepdims=True)).astype(out_ref.dtype)


def pack_params(emb_table, conv_ws, conv_bs, fcw, fcb):
    """One-time host-side packing: fold embedding into conv weights (bf16) + pack FC."""
    emb_pad = jnp.zeros((VOCAB_PAD, EMBED_DIM), jnp.float32).at[:VOCAB_NUM].set(emb_table)

    wfold = jnp.zeros((LFOLD + 8, C3), jnp.float32)
    for j, (w, b, K) in enumerate(zip(conv_ws, conv_bs, KERNEL_SIZES)):
        cols = slice(j * KERNEL_DIM, (j + 1) * KERNEL_DIM)
        for k in range(K):
            # Wfold[k*VOCAB_PAD + v, j*C + c] = sum_e emb_pad[v, e] * w[c, k, e]
            blk = emb_pad @ w[:, k, :].T                             # (VOCAB_PAD, KERNEL_DIM)
            wfold = wfold.at[k * VOCAB_PAD:(k + 1) * VOCAB_PAD, cols].set(blk)
        wfold = wfold.at[LFOLD, cols].set(b.reshape(-1))             # bias row
        wfold = wfold.at[LFOLD + 1, cols].set(float(SEQ_LEN - K))    # last valid t row
    convp = wfold.astype(jnp.bfloat16)                               # rows for pad tokens / k>=K stay 0

    fcp = jnp.zeros((C3 + 8, LABEL_NUM), jnp.float32)
    fcp = fcp.at[0:C3, :].set(fcw).at[C3, :].set(fcb.reshape(-1))
    return convp, fcp


def unfold_tokens(tokens):
    """(B, S) int32 -> (B, TMAX, KMAX) int32, window-unfolded, pre-offset by k*VOCAB_PAD.
       Out-of-range window slots get PAD_TOKEN, whose folded-weight row is zero."""
    B = tokens.shape[0]
    padded = jnp.full((B, SEQ_LEN + KMAX - 1), PAD_TOKEN, jnp.int32)
    padded = padded.at[:, :SEQ_LEN].set(tokens.astype(jnp.int32))
    tok_unf = jnp.stack([padded[:, k:k + TMAX] for k in range(KMAX)], axis=2)   # (B, TMAX, KMAX)
    return tok_unf + (jnp.arange(KMAX, dtype=jnp.int32) * VOCAB_PAD)[None, None, :]


def textcnn_forward(tokens, convp, fcp):
    B = tokens.shape[0]
    tok_unf = unfold_tokens(tokens)                      # index-data formatting only
    vmem = pl.BlockSpec(memory_space=pltpu.MemorySpace.VMEM)
    # TODO(synk): when BATCH grows, add a batch grid axis with
    #   compiler_params=pltpu.CompilerParams(dimension_semantics=("parallel",), vmem_limit_bytes=...)
    # (uses both v7x TensorCores; B-tile ~512-1024 bf16 rows on v7x, ~2x that on v5e/v6e),
    # keep the B-tile a multiple of 8 on the sublane axis for an unmasked output store,
    # and keep convp/fcp resident across calls for tiny-batch serving. Unnecessary at B=2.
    return pl.pallas_call(
        textcnn_kernel,
        out_shape=jax.ShapeDtypeStruct((B, LABEL_NUM), jnp.float32),
        in_specs=[vmem] * 3,
        out_specs=vmem,
    )(tok_unf, convp, fcp)


def reference_forward(tokens, emb_table, conv_ws, conv_bs, fcw, fcb):
    """Plain-JAX mirror of the PyTorch forward (inference path), all f32."""
    x = emb_table[tokens]                                     # (B, S, E)
    pooled = []
    for w, b, K in zip(conv_ws, conv_bs, KERNEL_SIZES):
        T = SEQ_LEN - K + 1
        acc = jnp.zeros((tokens.shape[0], T, KERNEL_DIM), jnp.float32)
        for k in range(K):
            acc = acc + jnp.einsum('bte,ce->btc', x[:, k:k + T, :], w[:, k, :])
        acc = jnp.maximum(acc + b.reshape(1, 1, -1), 0.0)
        pooled.append(jnp.max(acc, axis=1))
    feat = jnp.concatenate(pooled, axis=1)
    logits = feat @ fcw + fcb
    return jax.nn.softmax(logits, axis=1)


if __name__ == "__main__":
    key = jax.random.PRNGKey(0)
    ks = jax.random.split(key, 10)

    # Deterministic synthetic parameters (shapes follow TextCNN.__init__).
    emb_table = 0.1 * jax.random.normal(ks[0], (VOCAB_NUM, EMBED_DIM), jnp.float32)
    emb_table = emb_table.at[0].set(0.0)             # padding_idx=0 row

    w3 = 0.1 * jax.random.normal(ks[1], (KERNEL_DIM, KERNEL_SIZES[0], EMBED_DIM), jnp.float32)
    b3 = 0.1 * jax.random.normal(ks[2], (1, KERNEL_DIM), jnp.float32)
    w4 = 0.1 * jax.random.normal(ks[3], (KERNEL_DIM, KERNEL_SIZES[1], EMBED_DIM), jnp.float32)
    b4 = 0.1 * jax.random.normal(ks[4], (1, KERNEL_DIM), jnp.float32)
    w5 = 0.1 * jax.random.normal(ks[5], (KERNEL_DIM, KERNEL_SIZES[2], EMBED_DIM), jnp.float32)
    b5 = 0.1 * jax.random.normal(ks[6], (1, KERNEL_DIM), jnp.float32)

    fcw = 0.1 * jax.random.normal(ks[7], (C3, LABEL_NUM), jnp.float32)   # (in, out) layout
    fcb = 0.1 * jax.random.normal(ks[8], (1, LABEL_NUM), jnp.float32)

    tokens = jax.random.randint(ks[9], (BATCH, SEQ_LEN), 0, VOCAB_NUM, jnp.int32)

    convp, fcp = pack_params(emb_table, (w3, w4, w5), (b3, b4, b5), fcw, fcb)

    fwd = jax.jit(textcnn_forward)
    out = fwd(tokens, convp, fcp)
    out = jax.block_until_ready(out)

    ref = reference_forward(tokens, emb_table, (w3, w4, w5), (b3, b4, b5), fcw, fcb)

    assert out.shape == (BATCH, LABEL_NUM)
    assert jnp.allclose(jnp.sum(out, axis=1), 1.0, atol=5e-3)    # softmax rows sum to ~1
    assert jnp.allclose(out, ref, atol=2e-2)                     # matches plain-JAX f32 reference
    print("KERNEL_OK")
</pallas_src>

<mosaic_0001>
module attributes {stable_mosaic.version = 11 : i64} {
  func.func @textcnn_kernel(%arg0: memref<2x14x5xi32, #tpu.memory_space<vmem>>, %arg1: memref<328x24xbf16, #tpu.memory_space<vmem>>, %arg2: memref<32x4xf32, #tpu.memory_space<vmem>>, %arg3: memref<2x4xf32, #tpu.memory_space<vmem>>) attributes {dimension_semantics = [], scalar_prefetch = 0 : i64, scratch_operands = 0 : i64, tpu.core_type = #tpu.core_type<tc>} {
    %c0 = arith.constant 0 : index
    %c0_0 = arith.constant 0 : index
    %c0_1 = arith.constant 0 : index
    %0 = vector.load %arg0[%c0, %c0_0, %c0_1] : memref<2x14x5xi32, #tpu.memory_space<vmem>>, vector<2x14x5xi32>
    %1 = tpu.iota {dimensions = array<i32: 2>} : vector<2x14x320xi32>
    %2 = vector.extract_strided_slice %0 {offsets = [0, 0, 0], sizes = [2, 14, 1], strides = [1, 1, 1]} : vector<2x14x5xi32> to vector<2x14x1xi32>
    %3 = vector.broadcast %2 : vector<2x14x1xi32> to vector<2x14x320xi32>
    %4 = arith.cmpi eq, %3, %1 : vector<2x14x320xi32>
    %5 = vector.extract_strided_slice %0 {offsets = [0, 0, 1], sizes = [2, 14, 1], strides = [1, 1, 1]} : vector<2x14x5xi32> to vector<2x14x1xi32>
    %6 = vector.broadcast %5 : vector<2x14x1xi32> to vector<2x14x320xi32>
    %7 = arith.cmpi eq, %6, %1 : vector<2x14x320xi32>
    %8 = arith.ori %4, %7 : vector<2x14x320xi1>
    %9 = vector.extract_strided_slice %0 {offsets = [0, 0, 2], sizes = [2, 14, 1], strides = [1, 1, 1]} : vector<2x14x5xi32> to vector<2x14x1xi32>
    %10 = vector.broadcast %9 : vector<2x14x1xi32> to vector<2x14x320xi32>
    %11 = arith.cmpi eq, %10, %1 : vector<2x14x320xi32>
    %12 = arith.ori %8, %11 : vector<2x14x320xi1>
    %13 = vector.extract_strided_slice %0 {offsets = [0, 0, 3], sizes = [2, 14, 1], strides = [1, 1, 1]} : vector<2x14x5xi32> to vector<2x14x1xi32>
    %14 = vector.broadcast %13 : vector<2x14x1xi32> to vector<2x14x320xi32>
    %15 = arith.cmpi eq, %14, %1 : vector<2x14x320xi32>
    %16 = arith.ori %12, %15 : vector<2x14x320xi1>
    %17 = vector.extract_strided_slice %0 {offsets = [0, 0, 4], sizes = [2, 14, 1], strides = [1, 1, 1]} : vector<2x14x5xi32> to vector<2x14x1xi32>
    %18 = vector.broadcast %17 : vector<2x14x1xi32> to vector<2x14x320xi32>
    %19 = arith.cmpi eq, %18, %1 : vector<2x14x320xi32>
    %20 = arith.ori %16, %19 : vector<2x14x320xi1>
    %21 = arith.extui %20 : vector<2x14x320xi1> to vector<2x14x320xi32>
    %22 = arith.sitofp %21 : vector<2x14x320xi32> to vector<2x14x320xf32>
    %23 = arith.truncf %22 : vector<2x14x320xf32> to vector<2x14x320xbf16>
    %c0_2 = arith.constant 0 : index
    %c0_3 = arith.constant 0 : index
    %24 = vector.load %arg1[%c0_2, %c0_3] : memref<328x24xbf16, #tpu.memory_space<vmem>>, vector<320x24xbf16>
    %c320 = arith.constant 320 : index
    %c0_4 = arith.constant 0 : index
    %25 = vector.load %arg1[%c320, %c0_4] : memref<328x24xbf16, #tpu.memory_space<vmem>>, vector<8x24xbf16>
    %26 = arith.extf %25 : vector<8x24xbf16> to vector<8x24xf32>
    %27 = vector.extract_strided_slice %26 {offsets = [0, 0], sizes = [1, 24], strides = [1, 1]} : vector<8x24xf32> to vector<1x24xf32>
    %28 = vector.shape_cast %27 : vector<1x24xf32> to vector<1x1x24xf32>
    %29 = vector.extract_strided_slice %26 {offsets = [1, 0], sizes = [1, 24], strides = [1, 1]} : vector<8x24xf32> to vector<1x24xf32>
    %30 = vector.shape_cast %29 : vector<1x24xf32> to vector<1x1x24xf32>
    %cst = arith.constant dense<0.000000e+00> : vector<2x14x24xf32>
    %31 = tpu.matmul %23, %24, %cst {dimension_numbers = #tpu.dot_dimension_numbers<[2], [0], [0, 1], [1], [0, 0, 0, 1, 1, 1], [], []>} : vector<2x14x320xbf16>, vector<320x24xbf16>, vector<2x14x24xf32> -> vector<2x14x24xf32>
    %32 = vector.broadcast %28 : vector<1x1x24xf32> to vector<2x14x24xf32>
    %33 = arith.addf %31, %32 : vector<2x14x24xf32>
    %cst_5 = arith.constant 0.000000e+00 : f32
    %34 = vector.broadcast %cst_5 : f32 to vector<2x14x24xf32>
    %35 = arith.maximumf %33, %34 : vector<2x14x24xf32>
    %36 = tpu.iota {dimensions = array<i32: 1>} : vector<2x14x24xi32>
    %37 = arith.sitofp %36 : vector<2x14x24xi32> to vector<2x14x24xf32>
    %38 = vector.broadcast %30 : vector<1x1x24xf32> to vector<2x14x24xf32>
    %39 = arith.cmpf ole, %37, %38 : vector<2x14x24xf32>
    %cst_6 = arith.constant 0.000000e+00 : f32
    %40 = vector.broadcast %cst_6 : f32 to vector<2x14x24xf32>
    %41 = arith.select %39, %35, %40 : vector<2x14x24xi1>, vector<2x14x24xf32>
    %cst_7 = arith.constant dense<0xFF800000> : vector<2x24xf32>
    %42 = vector.multi_reduction <maximumf>, %41, %cst_7 [1] : vector<2x14x24xf32> to vector<2x24xf32>
    %c0_8 = arith.constant 0 : index
    %c0_9 = arith.constant 0 : index
    %43 = vector.load %arg2[%c0_8, %c0_9] : memref<32x4xf32, #tpu.memory_space<vmem>>, vector<24x4xf32>
    %c24 = arith.constant 24 : index
    %c0_10 = arith.constant 0 : index
    %44 = vector.load %arg2[%c24, %c0_10] : memref<32x4xf32, #tpu.memory_space<vmem>>, vector<1x4xf32>
    %cst_11 = arith.constant dense<0.000000e+00> : vector<2x4xf32>
    %45 = tpu.matmul %42, %43, %cst_11 {dimension_numbers = #tpu.dot_dimension_numbers<[1], [0], [0], [1], [0, 0, 1, 1], [], []>} : vector<2x24xf32>, vector<24x4xf32>, vector<2x4xf32> -> vector<2x4xf32>
    %46 = vector.broadcast %44 : vector<1x4xf32> to vector<2x4xf32>
    %47 = arith.addf %45, %46 : vector<2x4xf32>
    %cst_12 = arith.constant dense<0xFF800000> : vector<2xf32>
    %48 = vector.multi_reduction <maximumf>, %47, %cst_12 [1] : vector<2x4xf32> to vector<2xf32>
    %49 = vector.shape_cast %48 : vector<2xf32> to vector<2x1xf32>
    %50 = vector.broadcast %49 : vector<2x1xf32> to vector<2x4xf32>
    %51 = arith.subf %47, %50 : vector<2x4xf32>
    %52 = math.exp %51 : vector<2x4xf32>
    %cst_13 = arith.constant dense<0.000000e+00> : vector<2xf32>
    %53 = vector.multi_reduction <add>, %52, %cst_13 [1] : vector<2x4xf32> to vector<2xf32>
    %54 = vector.shape_cast %53 : vector<2xf32> to vector<2x1xf32>
    %55 = vector.broadcast %54 : vector<2x1xf32> to vector<2x4xf32>
    %56 = arith.divf %52, %55 : vector<2x4xf32>
    %c0_14 = arith.constant 0 : index
    %c0_15 = arith.constant 0 : index
    %57 = vector.load %arg3[%c0_14, %c0_15] : memref<2x4xf32, #tpu.memory_space<vmem>>, vector<2x4xf32>
    tpu.vector_store %arg3[%c0_14, %c0_15], %56 {strides = array<i32>} : memref<2x4xf32, #tpu.memory_space<vmem>>, vector<2x4xf32>,
    return
  }
}

</mosaic_0001>

<bundles_post_ra>
// kernel: textcnn_forward.1
= control target key start
LH: loop header
LB: loop body
LE: loop exit
PB: predicated region body
PF: predicated region fallthrough
CT: control target
= control target key end

     0   :  { %v1323_v1 = vmov 2   ;;  %v1324_v2 = vmov 0   ;;  %v1325_v6 = vmov 1   ;;  %s1844_s0 = inlined_call_operand.vmem [shape: s32[2,14,5], index: 0, kind: input, shape index: {}]   ;;  %s1845_s1 = inlined_call_operand.vmem [shape: bf16[328,24], index: 1, kind: input, shape index: {}]   ;;  %s1846_s2 = inlined_call_operand.vmem [shape: f32[32,4], index: 2, kind: input, shape index: {}]   ;;  %s1847_s3 = inlined_call_operand.hbm [shape: f32[2,4], index: 3, kind: output, shape index: {}]  }
   0x1   :  { %v17_v0 = vld [vmem:[%s1844_s0 + $0x8] sm:$0x3f]  ;;  %1263 = vset.pattern.permute.xlu1 %v1323_v1  ;;  %1262 = vset.pattern.permute.xlu0 %v1324_v2  ;;  %v19_v3 = vld [vmem:[%s1844_s0 + $0x18] sm:$0x3f]  ;;  %v16_v4 = vld [vmem:[%s1844_s0] sm:$0xff] }
   0x2   :  { %88 = vperm.xlu1 %1263, %v17_v0   ;;  %28 = vperm.xlu0 %1262, %v17_v0   ;;  %v18_v5 = vld [vmem:[%s1844_s0 + $0x10] sm:$0xff] }
   0x6   :  { %1264 = vset.pattern.permute.xlu1 %v1324_v2  ;;  %34 = vperm.xlu0 %1262, %v19_v3  }
   0x7   :  { %25 = vperm.xlu1 %1264, %v16_v4  }
   0xa   :  { %1265 = vset.pattern.permute.xlu0 %v1325_v6 }
   0xb   :  { %52 = vperm.xlu0 %1265, %v17_v0   ;;  %31 = vperm.xlu1 %1264, %v18_v5  }
   0xf   :  { %1266 = vset.pattern.permute.xlu1 %v1325_v6  ;;  %58 = vperm.xlu0 %1265, %v19_v3  }
  0x10   :  { %49 = vperm.xlu1 %1266, %v16_v4  }
  0x11   :  { %8 = vsyncpa [#allocation3], 0  ;;  %v1326_v7 = vmov 3   ;;  %v1327_v8 = vmov 4   ;;  %v1275_v9 = vld [vmem:[%s1845_s1 + $0x40] sm:$0xff]   ;;  %v1277_v11 = vld [vmem:[%s1845_s1 + $0x48] sm:$0xff]   ;;  %v20_v34 = vlaneseq }
  0x12   :  { %v1276_v10 = vld [vmem:[%s1845_s1] sm:$0xff]   ;;  %1189 = vmatprep.subr.bf16.mxu0 %v1275_v9  ;;  %v1278_v12 = vld [vmem:[%s1845_s1 + $0x8] sm:$0xff]   ;;  %v1279_v13 = vld [vmem:[%s1845_s1 + $0x50] sm:$0xff]   ;;  %v1856_v48 = vmov 0  ;;  %v1858_v49 = vmov 0  ;;  %v1860_v50 = vmov 0 }
  0x13   :  { %1269 = vset.pattern.permute.xlu0 %v1323_v1  ;;  %1190 = vmatpush3.bf16.msra.mxu0 %v1276_v10  ;;  %v1280_v14 = vld [vmem:[%s1845_s1 + $0x10] sm:$0xff]   ;;  %v1281_v15 = vld [vmem:[%s1845_s1 + $0x58] sm:$0xff]   ;;  %v1283_v17 = vld [vmem:[%s1845_s1 + $0x60] sm:$0xff]   ;;  %v1429_v36 = vand.u32 127, %v20_v34  ;;  %v1862_v52 = vmov 0  ;;  %v1864_v54 = vmov 0 }
  0x14   :  { %55 = vperm.xlu1 %1266, %v18_v5   ;;  %91 = vperm.xlu0 %1269, %v18_v5   ;;  %v1282_v16 = vld [vmem:[%s1845_s1 + $0x18] sm:$0xff]   ;;  %v1285_v18 = vld [vmem:[%s1845_s1 + $0x80] sm:$0xff]   ;;  %v1288_v19 = vld [vmem:[%s1845_s1 + $0x88] sm:$0xff]   ;;  %v1866_v55 = vmov 0  ;;  %v1868_v56 = vmov 0  ;;  %v1870_v57 = vmov 0 }
  0x15   :  { %1191 = vmatprep.subr.bf16.mxu0 %v1277_v11  ;;  %v1284_v20 = vld [vmem:[%s1845_s1 + $0x20] sm:$0xff]   ;;  %1227 = vmatprep.subr.bf16.mxu1 %v1285_v18  ;;  %v1286_v21 = vld [vmem:[%s1845_s1 + $0x68] sm:$0xff]   ;;  %v1291_v22 = vld [vmem:[%s1845_s1 + $0x90] sm:$0xff]   ;;  %v1434_v39 = vadd.s32 128, %v1429_v36  ;;  %v1437_v41 = vadd.s32 256, %v1429_v36  ;;  %v1872_v59 = vmov 0 }
  0x16   :  { %1228 = vmatpush3.bf16.msra.mxu1 %v1285_v18  ;;  %v1287_v23 = vld [vmem:[%s1845_s1 + $0x28] sm:$0xff]   ;;  %v1289_v24 = vld [vmem:[%s1845_s1 + $0x70] sm:$0xff]   ;;  %v1294_v25 = vld [vmem:[%s1845_s1 + $0x98] sm:$0xff]   ;;  %v1874_v61 = vmov 0  ;;  %v1878_v62 = vmov 0  ;;  %v1883_v63 = vmov 0 }
  0x17   :  { %1192 = vmatpush3.bf16.msra.mxu0 %v1278_v12  ;;  %1229 = vmatprep.subr.bf16.mxu1 %v1288_v19  ;;  %v1290_v26 = vld [vmem:[%s1845_s1 + $0x30] sm:$0xff]   ;;  %v1292_v27 = vld [vmem:[%s1845_s1 + $0x78] sm:$0xff]   ;;  %v1888_v2 = vmov 0  ;;  %v1901_v9 = vmov 0  ;;  %v1906_v11 = vmov 0  ;;  %s1333_s13 = smov [#allocation2]  }
  0x18   :  { %1267 = vset.pattern.permute.xlu1 %v1326_v7  ;;  %1271 = vset.pattern.permute.xlu0 %v1326_v7  ;;  %v1293_v28 = vld [vmem:[%s1845_s1 + $0x38] sm:$0xff]   ;;  %s1138_s14 = sshll.u32 %s1333_s13, 4  ;;  %s1139_s14 = int_to_ptr.vmem [resolvable:$true] %s1138_s14 }
  0x19   :  { %124 = vperm.xlu1 %1267, %v17_v0   ;;  %121 = vperm.xlu0 %1271, %v16_v4   ;;  %p1304_p1 = scmp.lt.s32.totalorder %s1139_s14, %s1139_s14 }
  0x1a   :  { %1193 = vmatprep.subr.bf16.mxu0 %v1279_v13  ;;  %1230 = vmatpush3.bf16.msra.mxu1 %v1288_v19  ;;  %v1625_v13 = vshrl.u32 %v20_v34, 7 }
  0x1b   :  { %1194 = vmatpush3.bf16.msra.mxu0 %v1280_v14  ;;  %1231 = vmatprep.subr.bf16.mxu1 %v1291_v22 }
  0x1c   :  { %1195 = vmatprep.subr.bf16.mxu0 %v1281_v15  ;;  %v1909_v15 = vmov 0 }
  0x1d   :  { %1268 = vset.pattern.permute.xlu1 %v1323_v1  ;;  %1273 = vset.pattern.permute.xlu0 %v1327_v8 }
  0x1e   :  { %85 = vperm.xlu1 %1268, %v16_v4   ;;  %157 = vperm.xlu0 %1273, %v16_v4   ;;  %v1328_v4 = vmov 1966171168  }
  0x1f   :  { %1196 = vmatpush3.bf16.msra.mxu0 %v1282_v16  ;;  %1232 = vmatpush3.bf16.msra.mxu1 %v1291_v22  ;;  %v1329_v16 = vmov 0.0  }
  0x20   :  { %1197 = vmatprep.subr.bf16.mxu0 %v1283_v17  ;;  %1233 = vmatprep.subr.bf16.mxu1 %v1294_v25 }
  0x22   :  { %94 = vperm.xlu1 %1268, %v19_v3  }
  0x23   :  { %1198 = vmatpush3.bf16.msra.mxu0 %v1284_v20  ;;  %1234 = vmatpush3.bf16.msra.mxu1 %v1294_v25 }
  0x24   :  { %1199 = vmatprep.subr.bf16.mxu0 %v1286_v21 }
  0x26   :  { %1270 = vset.pattern.permute.xlu1 %v1327_v8 }
  0x27   :  { %160 = vperm.xlu1 %1270, %v17_v0   ;;  %1200 = vmatpush3.bf16.msra.mxu0 %v1287_v23  ;;  %v1886_v0 = vmov 0 }
  0x28   :  { %1201 = vmatprep.subr.bf16.mxu0 %v1289_v24 }
  0x2b   :  { %1272 = vset.pattern.permute.xlu1 %v1326_v7  ;;  %1202 = vmatpush3.bf16.msra.mxu0 %v1290_v26 }
  0x2c   :  { %127 = vperm.xlu1 %1272, %v18_v5   ;;  %1203 = vmatprep.subr.bf16.mxu0 %v1292_v27 }
  0x2f   :  { %1204 = vmatpush3.bf16.msra.mxu0 %v1293_v28 }
  0x30   :  { %130 = vperm.xlu1 %1272, %v19_v3  }
  0x34   :  { %1274 = vset.pattern.permute.xlu1 %v1327_v8 }
  0x35   :  { %163 = vperm.xlu1 %1274, %v18_v5   ;;  %v278_v5 = vunpack.c.l.s4 %v1328_v4 }
  0x37   :  { %v279_v14 = vunpack.c.0.s8 %v278_v5 }
  0x39   :  { %166 = vperm.xlu1 %1274, %v19_v3   ;;  %v1652_v22 = vsub.s32 %v279_v14, %v1625_v13 }
  0x81   :  { %v89_v29 = vpop.permute.xlu1 %88  ;;  %v29_v30 = vpop.permute.xlu0 %28 }
  0x82   :  { %vm39_vm0 = vcmp.eq.s32.totalorder %v29_v30, %v1429_v36  ;;  %vm40_vm2 = vcmp.eq.s32.totalorder %v29_v30, %v1434_v39  ;;  %vm41_vm4 = vcmp.eq.s32.totalorder %v29_v30, %v1437_v41  ;;  %vm99_vm13 = vcmp.eq.s32.totalorder %v89_v29, %v1429_v36 }
  0x85   :  { %v1426_v32 = vpop.permute.xlu0 %34 }
  0x86   :  { %v26_v31 = vpop.permute.xlu1 %25 }
  0x87   :  { %vm36_vm10 = vcmp.eq.s32.totalorder %v26_v31, %v1429_v36  ;;  %vm37_vm14 = vcmp.eq.s32.totalorder %v26_v31, %v1434_v39 }
  0x8a   :  { %v32_v33 = vpop.permute.xlu1 %31  ;;  %v53_v35 = vpop.permute.xlu0 %52 }
  0x8b   :  { %vm63_vm1 = vcmp.eq.s32.totalorder %v53_v35, %v1429_v36  ;;  %vm64_vm3 = vcmp.eq.s32.totalorder %v53_v35, %v1434_v39  ;;  %vm65_vm5 = vcmp.eq.s32.totalorder %v53_v35, %v1437_v41 }
  0x8c   :  { %vm1445_vm6 = vmor %vm39_vm0, %vm63_vm1  ;;  %vm38_vm1 = vcmp.eq.s32.totalorder %v26_v31, %v1437_v41 }
  0x8d   :  { %vm1450_vm8 = vmor %vm40_vm2, %vm64_vm3 }
  0x8e   :  { %v1431_v38 = vpop.permute.xlu0 %58  ;;  %vm1458_vm11 = vmor %vm41_vm4, %vm65_vm5  ;;  %vm42_vm5 = vcmp.eq.s32.totalorder %v32_v33, %v1429_v36 }
  0x8f   :  { %v50_v37 = vpop.permute.xlu1 %49  ;;  %vm1478_vm4 = vmor %vm1445_vm6, %vm99_vm13  ;;  %vm44_vm6 = vcmp.eq.s32.totalorder %v32_v33, %v1437_v41 }
  0x90   :  { %vm60_vm7 = vcmp.eq.s32.totalorder %v50_v37, %v1429_v36  ;;  %vm61_vm9 = vcmp.eq.s32.totalorder %v50_v37, %v1434_v39  ;;  %vm62_vm12 = vcmp.eq.s32.totalorder %v50_v37, %v1437_v41  ;;  %v1859_v49 = vsel %vm1478_vm4, 4294967295, %v1858_v49 }
  0x91   :  { %vm1465_vm15 = vmor %vm36_vm10, %vm60_vm7 }
  0x92   :  { %vm1471_vm2 = vmor %vm37_vm14, %vm61_vm9  ;;  %vm43_vm9 = vcmp.eq.s32.totalorder %v32_v33, %v1434_v39 }
  0x93   :  { %v56_v40 = vpop.permute.xlu1 %55  ;;  %v1455_v44 = vpop.permute.xlu0 %91  ;;  %v1857_v48 = vsel %vm1471_vm2, 4294967295, %v1856_v48  ;;  %vm1483_vm7 = vmor %vm38_vm1, %vm62_vm12  ;;  %vm100_vm12 = vcmp.eq.s32.totalorder %v89_v29, %v1434_v39  ;;  %vm45_vm1 = vcmp.eq.s32.totalorder %v1426_v32, %v1429_v36 }
  0x94   :  { %vm66_vm0 = vcmp.eq.s32.totalorder %v56_v40, %v1429_v36  ;;  %vm67_vm3 = vcmp.eq.s32.totalorder %v56_v40, %v1434_v39  ;;  %v1861_v50 = vsel %vm1483_vm7, 4294967295, %v1860_v50  ;;  %vm68_vm10 = vcmp.eq.s32.totalorder %v56_v40, %v1437_v41 }
  0x95   :  { %vm1489_vm14 = vmor %vm42_vm5, %vm66_vm0  ;;  %vm69_vm7 = vcmp.eq.s32.totalorder %v1431_v38, %v1429_v36  ;;  %vm101_vm5 = vcmp.eq.s32.totalorder %v89_v29, %v1437_v41 }
  0x96   :  { %v1863_v52 = vsel %vm1489_vm14, 4294967295, %v1862_v52  ;;  %vm1494_vm13 = vmor %vm43_vm9, %vm67_vm3  ;;  %vm46_vm3 = vcmp.eq.s32.totalorder %v1426_v32, %v1434_v39  ;;  %vm70_vm9 = vcmp.eq.s32.totalorder %v1431_v38, %v1434_v39 }
  0x97   :  { %v1865_v54 = vsel %vm1494_vm13, 4294967295, %v1864_v54  ;;  %vm1503_vm4 = vmor %vm44_vm6, %vm68_vm10 }
  0x98   :  { %v125_v45 = vpop.permute.xlu1 %124  ;;  %v122_v51 = vpop.permute.xlu0 %121  ;;  %v1867_v55 = vsel %vm1503_vm4, 4294967295, %v1866_v55  ;;  %vm1515_vm13 = vmor %vm1450_vm8, %vm100_vm12 }
  0x99   :  { %v1869_v56 = vsel %vm1515_vm13, 4294967295, %v1868_v56  ;;  %vm1522_vm6 = vmor %vm1458_vm11, %vm101_vm5  ;;  %vm135_vm4 = vcmp.eq.s32.totalorder %v125_v45, %v1429_v36  ;;  %vm136_vm8 = vcmp.eq.s32.totalorder %v125_v45, %v1434_v39  ;;  %vm132_vm12 = vcmp.eq.s32.totalorder %v122_v51, %v1429_v36 }
  0x9a   :  { %v1871_v57 = vsel %vm1522_vm6, 4294967295, %v1870_v57  ;;  %vm1528_vm2 = vmor %vm45_vm1, %vm69_vm7  ;;  %vm137_vm5 = vcmp.eq.s32.totalorder %v125_v45, %v1437_v41  ;;  %vm133_vm14 = vcmp.eq.s32.totalorder %v122_v51, %v1434_v39  ;;  %vm1876_vm7 = vnez %v1857_v48 }
  0x9b   :  { %v1873_v59 = vsel %vm1528_vm2, 4294967295, %v1872_v59  ;;  %vm1536_vm11 = vmor %vm46_vm3, %vm70_vm9  ;;  %vm47_vm2 = vcmp.eq.s32.totalorder %v1426_v32, %v1437_v41  ;;  %vm71_vm6 = vcmp.eq.s32.totalorder %v1431_v38, %v1437_v41  ;;  %vm134_vm3 = vcmp.eq.s32.totalorder %v122_v51, %v1437_v41 }
  0x9c   :  { %v1875_v61 = vsel %vm1536_vm11, 4294967295, %v1874_v61  ;;  %vm1881_vm11 = vnez %v1861_v50 }
  0x9d   :  { %v86_v53 = vpop.permute.xlu1 %85  ;;  %v158_v60 = vpop.permute.xlu0 %157 }
  0x9e   :  { %vm96_vm0 = vcmp.eq.s32.totalorder %v86_v53, %v1429_v36  ;;  %vm97_vm10 = vcmp.eq.s32.totalorder %v86_v53, %v1434_v39  ;;  %vm1880_vm9 = vcmp.eq.s32.totalorder %v86_v53, %v1437_v41 }
  0x9f   :  { %vm108_vm13 = vmor %vm1465_vm15, %vm96_vm0  ;;  %vm1877_vm15 = vnez %v1859_v49 }
  0xa0   :  { %vm109_vm1 = vmor %vm1876_vm7, %vm97_vm10  ;;  %vm102_vm10 = vcmp.eq.s32.totalorder %v1455_v44, %v1429_v36 }
  0xa1   :  { %v95_v58 = vpop.permute.xlu1 %94  ;;  %vm1550_vm0 = vmor %vm1877_vm15, %vm135_vm4  ;;  %vm1882_vm4 = vnez %v1869_v56 }
  0xa2   :  { %v1879_v62 = vsel %vm1550_vm0, 4294967295, %v1878_v62  ;;  %vm110_vm7 = vmor %vm1881_vm11, %vm1880_vm9  ;;  %vm168_vm9 = vcmp.eq.s32.totalorder %v158_v60, %v1429_v36  ;;  %vm103_vm11 = vcmp.eq.s32.totalorder %v1455_v44, %v1434_v39 }
  0xa3   :  { %vm1563_vm15 = vmor %vm1882_vm4, %vm136_vm8  ;;  %vm1885_vm4 = vnez %v1871_v57 }
  0xa4   :  { %v1884_v63 = vsel %vm1563_vm15, 4294967295, %v1883_v63  ;;  %vm144_vm0 = vmor %vm108_vm13, %vm132_vm12  ;;  %vm169_vm12 = vcmp.eq.s32.totalorder %v158_v60, %v1434_v39 }
  0xa5   :  { %vm1572_vm8 = vmor %vm1885_vm4, %vm137_vm5  ;;  %vm104_vm4 = vcmp.eq.s32.totalorder %v1455_v44, %v1437_v41 }
  0xa6   :  { %v1887_v0 = vsel %vm1572_vm8, 4294967295, %v1886_v0  ;;  %vm145_vm15 = vmor %vm109_vm1, %vm133_vm14  ;;  %v161_v1 = vpop.permute.xlu1 %160  ;;  %vm170_vm8 = vcmp.eq.s32.totalorder %v158_v60, %v1437_v41  ;;  %vm1890_vm1 = vnez %v1863_v52 }
  0xa7   :  { %vm1577_vm13 = vmor %vm47_vm2, %vm71_vm6  ;;  %vm105_vm6 = vcmp.eq.s32.totalorder %v95_v58, %v1429_v36 }
  0xa8   :  { %v1889_v2 = vsel %vm1577_vm13, 4294967295, %v1888_v2  ;;  %vm146_vm5 = vmor %vm110_vm7, %vm134_vm3  ;;  %vm1895_vm13 = vnez %v1865_v54 }
  0xa9   :  { %vm1586_vm14 = vmor %vm1890_vm1, %vm102_vm10  ;;  %vm106_vm10 = vcmp.eq.s32.totalorder %v95_v58, %v1434_v39  ;;  %vm1900_vm1 = vnez %v1867_v55 }
  0xaa   :  { %vm1590_vm2 = vmor %vm144_vm0, %vm168_vm9 }
  0xab   :  { %vm1597_vm3 = vmor %vm1895_vm13, %vm103_vm11  ;;  %vm171_vm11 = vcmp.eq.s32.totalorder %v161_v1, %v1429_v36  ;;  %vm1905_vm13 = vnez %v1873_v59  ;;  %v128_v12 = vpop.permute.xlu1 %127  ;;  %v1146_v17 = vsel %vm1590_vm2, 1.0, %v1329_v16  ;;  %vm1914_vm2 = vnez %v1889_v2 }
  0xac   :  { %vm1601_vm7 = vmor %vm145_vm15, %vm169_vm12  ;;  %vm172_vm12 = vcmp.eq.s32.totalorder %v161_v1, %v1434_v39 }
  0xad   :  { %vm1608_vm0 = vmor %vm1900_vm1, %vm104_vm4  ;;  %vm1911_vm1 = vnez %v1879_v62  ;;  %v1147_v18 = vsel %vm1601_vm7, 1.0, %v1329_v16 }
  0xae   :  { %v1902_v9 = vsel %vm1608_vm0, 4294967295, %v1901_v9  ;;  %vm1612_vm9 = vmor %vm146_vm5, %vm170_vm8  ;;  %vm1908_vm8 = vnez %v1875_v61  ;;  %vm173_vm5 = vcmp.eq.s32.totalorder %v161_v1, %v1437_v41  ;;  %v1158_v26 = vpack.c.bf16 %v1147_v18, %v1146_v17 }
  0xaf   :  { %vm1619_vm15 = vmor %vm1905_vm13, %vm105_vm6  ;;  %vm107_vm6 = vcmp.eq.s32.totalorder %v95_v58, %v1437_v41  ;;  %v131_v21 = vpop.permute.xlu1 %130  ;;  %v1148_v23 = vsel %vm1612_vm9, 1.0, %v1329_v16 }
  0xb0   :  { %v1907_v11 = vsel %vm1619_vm15, 4294967295, %v1906_v11  ;;  %vm1629_vm4 = vmor %vm1908_vm8, %vm106_vm10  ;;  %vm1912_vm10 = vnez %v1884_v63  ;;  %vm1913_vm15 = vnez %v1887_v0  ;;  %vm141_vm9 = vcmp.eq.s32.totalorder %v131_v21, %v1429_v36 }
  0xb1   :  { %v1910_v15 = vsel %vm1629_vm4, 4294967295, %v1909_v15  ;;  %vm183_vm13 = vmor %vm1911_vm1, %vm171_vm11  ;;  %vm138_vm4 = vcmp.eq.s32.totalorder %v128_v12, %v1429_v36  ;;  %vm139_vm11 = vcmp.eq.s32.totalorder %v128_v12, %v1434_v39  ;;  %v283_v37 = vrot.slane %v1158_v26, %v1652_v22 }
  0xb2   :  { %vm184_vm8 = vmor %vm1912_vm10, %vm172_vm12  ;;  %v1149_v19 = vsel %vm183_vm13, 1.0, %v1329_v16 }
  0xb3   :  { %vm185_vm0 = vmor %vm1913_vm15, %vm173_vm5  ;;  %v1150_v20 = vsel %vm184_vm8, 1.0, %v1329_v16  ;;  %vm140_vm15 = vcmp.eq.s32.totalorder %v128_v12, %v1437_v41 }
  0xb4   :  { %vm1659_vm7 = vmor %vm1914_vm2, %vm107_vm6  ;;  %v1151_v25 = vsel %vm185_vm0, 1.0, %v1329_v16  ;;  %v1159_v28 = vpack.c.bf16 %v1150_v20, %v1149_v19  ;;  %vm142_vm0 = vcmp.eq.s32.totalorder %v131_v21, %v1434_v39  ;;  %vm1921_vm6 = vnez %v1902_v9  ;;  %v164_v35 = vpop.permute.xlu1 %163 }
  0xb5   :  { %v218_v27 = vpack.c.bf16 %v1151_v25, %v1148_v23  ;;  %vm1667_vm12 = vmor %vm1586_vm14, %vm138_vm4  ;;  %v1160_v30 = vpack.c.bf16 %v1151_v25, %v1151_v25  ;;  %vm143_vm14 = vcmp.eq.s32.totalorder %v131_v21, %v1437_v41  ;;  %vm1924_vm4 = vnez %v1907_v11 }
  0xb6   :  { %vm1674_vm5 = vmor %vm1597_vm3, %vm139_vm11  ;;  %v290_v38 = vrot.slane %v1159_v28, %v1652_v22  ;;  %vm1927_vm3 = vnez %v1910_v15  ;;  %vm174_vm11 = vcmp.eq.s32.totalorder %v164_v35, %v1429_v36  ;;  %vm175_vm2 = vcmp.eq.s32.totalorder %v164_v35, %v1434_v39 }
  0xb7   :  { %v297_v32 = vrot.slane %v218_v27, %v1652_v22  ;;  %vm1682_vm1 = vmor %vm1921_vm6, %vm140_vm15  ;;  %v304_v42 = vrot.slane %v1160_v30, %v1652_v22  ;;  %vm176_vm15 = vcmp.eq.s32.totalorder %v164_v35, %v1437_v41 }
  0xb8   :  { %vm1689_vm13 = vmor %vm1924_vm4, %vm141_vm9  ;;  %v167_v47 = vpop.permute.xlu1 %166 }
  0xb9   :  { %vm1697_vm10 = vmor %vm1927_vm3, %vm142_vm0  ;;  %v305_v44 = vcombine.low %v283_v37, %v297_v32  ;;  %v306_v45 = vcombine.high %v283_v37, %v297_v32  ;;  %vm177_vm6 = vcmp.eq.s32.totalorder %v167_v47, %v1429_v36  ;;  %vm179_vm4 = vcmp.eq.s32.totalorder %v167_v47, %v1437_v41 }
  0xba   :  { %vm1704_vm8 = vmor %vm1659_vm7, %vm143_vm14  ;;  %vm178_vm14 = vcmp.eq.s32.totalorder %v167_v47, %v1434_v39  ;;  %v307_v49 = vcombine.low %v290_v38, %v304_v42  ;;  %v308_v50 = vcombine.high %v290_v38, %v304_v42  ;;  %vm1331_vm3 = vmmov 0  }
  0xbb   :  { %vm186_vm9 = vmor %vm1667_vm12, %vm174_vm11  ;;  %v315_v52 = vrot.slane %v305_v44, %v1652_v22  ;;  %v329_v53 = vrot.slane %v306_v45, %v1652_v22 }
  0xbc   :  { %vm187_vm0 = vmor %vm1674_vm5, %vm175_vm2  ;;  %v1152_v46 = vsel %vm186_vm9, 1.0, %v1329_v16  ;;  %v322_v58 = vrot.slane %v307_v49, %v1652_v22  ;;  %v336_v60 = vrot.slane %v308_v50, %v1652_v22  ;;  %vm1119_vm9 = vcmask 25600  }
  0xbd   :  { %vm188_vm7 = vmor %vm1682_vm1, %vm176_vm15  ;;  %v1153_v48 = vsel %vm187_vm0, 1.0, %v1329_v16  ;;  %v424_v61 = vcombine.low %v315_v52, %v329_v53  ;;  %v1164_v62 = vcombine.high %v315_v52, %v329_v53  ;;  %v1035_v53 = vld [vmem:[%s1846_s2] sm:$0xff]  ;;  %vm1045_vm15 = vcmask 1041409  }
  0xbe   :  { %vm189_vm12 = vmor %vm1689_vm13, %vm177_vm6  ;;  %v1161_v54 = vpack.c.bf16 %v1153_v48, %v1152_v46  ;;  %v1154_v39 = vsel %vm188_vm7, 1.0, %v1329_v16  ;;  %v426_v6 = vcombine.low %v322_v58, %v336_v60  ;;  %v338_v11 = vcombine.high %v322_v58, %v322_v58 }
  0xbf   :  { %vm190_vm5 = vmor %vm1697_vm10, %vm178_vm14  ;;  %v1155_v51 = vsel %vm189_vm12, 1.0, %v1329_v16  ;;  %v434_v7 = vrot.slane %v424_v61, %v1652_v22  ;;  %v441_v8 = vrot.slane %v1164_v62, %v1652_v22  ;;  %vm720_vm13 = vcmask 523264  }
  0xc0   :  { %vm191_vm1 = vmor %vm1704_vm8, %vm179_vm4  ;;  %v1156_v36 = vsel %vm190_vm5, 1.0, %v1329_v16  ;;  %v349_v63 = vrot.slane %v1161_v54, %v1652_v22  ;;  %v448_v20 = vrot.slane %v426_v6, %v1652_v22  ;;  %v1036_v54 = vld [vmem:[%s1846_s2 + $0x8] sm:$0xff]  ;;  %vm1015_vm10 = vcmask 195584  }
  0xc1   :  { %v1157_v41 = vsel %vm191_vm1, 1.0, %v1329_v16  ;;  %v1162_v55 = vpack.c.bf16 %v1156_v36, %v1155_v51  ;;  %v457_v21 = vcombine.high %v434_v7, %v441_v8  ;;  %v456_v23 = vcombine.low %v434_v7, %v441_v8 }
  0xc2   :  { %v221_v56 = vpack.c.bf16 %v1157_v41, %v1154_v39  ;;  %v1163_v57 = vpack.c.bf16 %v1157_v41, %v1157_v41  ;;  %v1330_v36 = vmov 0.0|0.0   ;;  %v1037_v39 = vld [vmem:[%s1846_s2 + $0x10] sm:$0xff]  ;;  %v1773_v41 = vld [vmem:[%s1845_s1 + $0xa0] sm:$0xf]  ;;  %vm1017_vm8 = vcmask 193536  }
  0xc3   :  { %v356_v59 = vrot.slane %v1162_v55, %v1652_v22  ;;  %v473_v32 = vrot.slane %v457_v21, %v1652_v22  ;;  %v466_v33 = vrot.slane %v456_v23, %v1652_v22  ;;  %1248 = vmatprep.subr.bf16.mxu1 %v1330_v36  ;;  %v263_v55 = vunpack.c.l.bf16 %v1773_v41 }
  0xc4   :  { %v363_v0 = vrot.slane %v221_v56, %v1652_v22  ;;  %v370_v1 = vrot.slane %v1163_v57, %v1652_v22  ;;  %v266_v56 = vsub.s32 0, %v1625_v13  ;;  %v1332_v57 = vmov 1983009808  }
  0xc5   :  { %v409_v58 = vunpack.c.l.s4 %v1332_v57 }
  0xc6   :  { %v371_v2 = vcombine.low %v349_v63, %v363_v0  ;;  %v372_v3 = vcombine.high %v349_v63, %v363_v0  ;;  %v373_v4 = vcombine.low %v356_v59, %v370_v1  ;;  %v374_v5 = vcombine.high %v356_v59, %v370_v1 }
  0xc7   :  { %v267_v59 = vrot.slane %v263_v55, %v266_v56  ;;  %v410_v60 = vunpack.c.0.s8 %v409_v58 }
  0xc8   :  { %v388_v9 = vrot.slane %v373_v4, %v1652_v22  ;;  %v395_v10 = vrot.slane %v372_v3, %v1652_v22  ;;  %v381_v12 = vrot.slane %v371_v2, %v1652_v22  ;;  %v402_v14 = vrot.slane %v374_v5, %v1652_v22 }
  0xc9   :  { %v407_v61 = vcombine.high %v267_v59, %v267_v59 }
  0xca   :  { %v403_v15 = vcombine.high %v381_v12, %v381_v12  ;;  %v427_v17 = vcombine.low %v338_v11, %v381_v12  ;;  %v404_v18 = vcombine.high %v388_v9, %v388_v9  ;;  %v405_v19 = vcombine.high %v395_v10, %v395_v10 }
  0xcc   :  { %v455_v24 = vrot.slane %v427_v17, %v1652_v22  ;;  %v491_v25 = vcombine.low %v395_v10, %v403_v15  ;;  %v492_v26 = vcombine.low %v405_v19, %v388_v9  ;;  %v493_v27 = vcombine.low %v402_v14, %v404_v18 }
  0xce   :  { %v459_v28 = vcombine.high %v448_v20, %v455_v24  ;;  %v458_v29 = vcombine.low %v448_v20, %v455_v24  ;;  %v500_v30 = vrot.slane %v491_v25, %v1652_v22  ;;  %v507_v31 = vrot.slane %v492_v26, %v1652_v22 }
  0xcf   :  { %v514_v34 = vrot.slane %v493_v27, %v1652_v22 }
  0xd0   :  { %v487_v35 = vrot.slane %v459_v28, %v1652_v22  ;;  %v480_v37 = vrot.slane %v458_v29, %v1652_v22  ;;  %v516_v38 = vcombine.high %v500_v30, %v507_v31  ;;  %v515_v40 = vcombine.low %v500_v30, %v507_v31 }
  0xd1   :  { %v517_v42 = vcombine.high %v514_v34, %v514_v34  ;;  %v538_v49 = vrot.slane %v514_v34, %v1652_v22  ;;  %v918_v30 = vadd.s32 8, %v1625_v13 }
  0xd2   :  { %v490_v43 = vcombine.low %v473_v32, %v487_v35  ;;  %v489_v44 = vcombine.high %v466_v33, %v480_v37  ;;  %v488_v45 = vcombine.low %v466_v33, %v480_v37  ;;  %v531_v46 = vrot.slane %v516_v38, %v1652_v22 }
  0xd3   :  { %v545_v47 = vrot.slane %v517_v42, %v1652_v22  ;;  %v524_v48 = vrot.slane %v515_v40, %v1652_v22  ;;  %v1249_v22 = vpack.c.bf16 %v1036_v54, %v1035_v53  ;;  %v923_v38 = vsub.s32 1, %v1625_v13 }
  0xd4   :  { %759 = vmatprep.mubr.bf16.mxu0 %v490_v43  ;;  %1235 = vmatprep.mubr.msk.bf16.mxu1 %vm720_vm13, %v489_v44 }
  0xd5   :  { %760 = vmatmul.mubr.bf16.vlgmr.msra.gmra.mrb[0].mxu0 %v488_v45  ;;  %v548_v50 = vcombine.low %v531_v46, %v545_v47  ;;  %v547_v51 = vcombine.high %v524_v48, %v538_v49  ;;  %v546_v52 = vcombine.low %v524_v48, %v538_v49  ;;  %v919_v48 = vcvt.s32.f32 %v1625_v13 }
  0xd6   :  { %v920_v49 = vcvt.s32.f32 %v918_v30 }
  0xd7   :  { %767 = vmatprep.mubr.bf16.mxu0 %v548_v50  ;;  %1236 = vmatmul.mubr.msk.bf16.vlgmr.msra.gmra.mrb[0].mxu1 %vm720_vm13, %v547_v51 }
  0xd8   :  { %1245 = vmatprep.mubr.msk.f32.mxu1 %vm1331_vm3, %v1329_v16  ;;  %1250 = vmatpush3.bf16.msra.mxu1 %v1249_v22 }
  0xd9   :  { %1243 = vmatprep.subr.mxu1 %v1329_v16  ;;  %v1778_v16 = vsub.s32 %v410_v60, %v1625_v13 }
  0xdb   :  { %v414_v62 = vrot.slane %v267_v59, %v1778_v16  ;;  %v421_v63 = vrot.slane %v407_v61, %v1778_v16 }
  0xdc   :  { %1244 = vmatpush3.msra.mxu1 %v1037_v39  ;;  %v924_v39 = vrot.slane %v263_v55, %v923_v38 }
  0xdd   :  { %768 = vmatmul.mubr.bf16.gmra.mrb[4].mxu0 %v546_v52  ;;  %v422_v0 = vcombine.high %v414_v62, %v414_v62  ;;  %v423_v1 = vcombine.high %v421_v63, %v421_v63  ;;  %v690_v4 = vcombine.low %v421_v63, %v414_v62 }
  0xde   :  { %vm1798_vm11 = vcmp.le.f32.partialorder %v919_v48, %v924_v39  ;;  %vm1805_vm2 = vcmp.le.f32.partialorder %v920_v49, %v924_v39 }
  0xdf   :  { %v673_v2 = vcombine.low %v414_v62, %v422_v0  ;;  %v674_v3 = vcombine.low %v421_v63, %v423_v1  ;;  %v697_v7 = vrot.slane %v690_v4, %v1778_v16  ;;  %v699_v11 = vcombine.low %v422_v0, %v421_v63 }
  0xe0   :  { %v700_v12 = vcombine.low %v423_v1, %v414_v62 }
  0xe1   :  { %v681_v5 = vrot.slane %v673_v2, %v1778_v16  ;;  %v688_v6 = vrot.slane %v674_v3, %v1778_v16  ;;  %v707_v26 = vrot.slane %v699_v11, %v1778_v16 }
  0xe2   :  { %v714_v27 = vrot.slane %v700_v12, %v1778_v16 }
  0xe3   :  { %v689_v9 = vcombine.low %v681_v5, %v688_v6  ;;  %v698_v18 = vcombine.low %v681_v5, %v697_v7 }
  0xe4   :  { %v715_v35 = vcombine.low %v707_v26, %v714_v27 }
 0x1a8   :  { %v1205_v8 = vpop.f32.mrb[0].mxu0 }
 0x1a9   :  { %v1206_v10 = vpop.f32.mrb[1].mxu0 }
 0x1aa   :  { %v1207_v14 = vadd.f32 %v1206_v10, %v1205_v8  ;;  %v1237_v15 = vpop.f32.mrb[0].mxu1  ;;  %v1208_v17 = vpop.f32.mrb[2].mxu0 }
 0x1ab   :  { %v810_v19 = vpop.f32.mrb[1].mxu1  ;;  %v1209_v20 = vpop.f32.mrb[3].mxu0 }
 0x1ac   :  { %v762_v21 = vadd.f32 %v1207_v14, %v689_v9  ;;  %v1210_v23 = vadd.f32 %v1209_v20, %v1208_v17  ;;  %v1238_v24 = vpop.f32.mrb[2].mxu1 }
 0x1ad   :  { %v813_v25 = vpop.f32.mrb[3].mxu1 }
 0x1ae   :  { %v811_v28 = vadd.f32 %v810_v19, %v762_v21  ;;  %v765_v29 = vadd.f32 %v1210_v23, %v698_v18 }
 0x1b0   :  { %v829_v31 = vcombine.high %v811_v28, %v811_v28  ;;  %v836_v32 = vrot.slane %v811_v28, %v1778_v16  ;;  %v814_v33 = vadd.f32 %v813_v25, %v765_v29  ;;  %v1211_v34 = vpop.f32.mrb[4].mxu0 }
 0x1b1   :  { %v1212_v37 = vpop.f32.mrb[5].mxu0 }
 0x1b2   :  { %v843_v40 = vrot.slane %v829_v31, %v1778_v16  ;;  %v844_v42 = vcombine.high %v836_v32, %v836_v32  ;;  %v846_v43 = vcombine.high %v814_v33, %v814_v33  ;;  %v1214_v44 = vpop.f32.mrb[6].mxu0  ;;  %v853_v45 = vrot.slane %v814_v33, %v1778_v16 }
 0x1b3   :  { %v1213_v46 = vadd.f32 %v1212_v37, %v1211_v34  ;;  %v1215_v47 = vpop.f32.mrb[7].mxu0  ;;  %v902_v51 = vmax.f32 %v836_v32, 0.0 }
 0x1b4   :  { %v845_v50 = vcombine.high %v843_v40, %v843_v40  ;;  %v903_v52 = vmax.f32 %v844_v42, 0.0  ;;  %v860_v53 = vrot.slane %v846_v43, %v1778_v16  ;;  %v861_v54 = vcombine.high %v853_v45, %v853_v45 }
 0x1b5   :  { %v770_v36 = vadd.f32 %v1213_v46, %v715_v35  ;;  %v1216_v22 = vadd.f32 %v1215_v47, %v1214_v44  ;;  %v904_v41 = vmax.f32 %v843_v40, 0.0  ;;  %v906_v59 = vmax.f32 %v853_v45, 0.0 }
 0x1b6   :  { %v905_v56 = vmax.f32 %v845_v50, 0.0  ;;  %v941_v57 = vcombine.low %v902_v51, %v903_v52  ;;  %v908_v58 = vmax.f32 %v860_v53, 0.0  ;;  %v907_v60 = vmax.f32 %v861_v54, 0.0 }
 0x1b7   :  { %v819_v61 = vadd.f32 %v1237_v15, %v770_v36  ;;  %v773_v62 = vadd.f32 %v1216_v22, %v707_v26  ;;  %v862_v13 = vcombine.high %v860_v53, %v860_v53 }
 0x1b8   :  { %v942_v63 = vcombine.low %v904_v41, %v905_v56  ;;  %v958_v0 = vcombine.low %v906_v59, %v907_v60  ;;  %v949_v4 = vrot.slane %v941_v57, %v1778_v16  ;;  %v972_v5 = vrot.slane %v908_v58, %v1778_v16  ;;  %v1187_v57 = vld [vmem:[%s1846_s2 + $0x18] ss:$0 sm:$0xff]  ;;  %s1299_s2 = scalar_lea.vmem %s1139_s14, 32 }
 0x1b9   :  { %v863_v1 = vcombine.high %v819_v61, %v819_v61  ;;  %v870_v2 = vrot.slane %v819_v61, %v1778_v16  ;;  %v822_v3 = vadd.f32 %v1238_v24, %v773_v62  ;;  %v909_v12 = vmax.f32 %v862_v13, 0.0  ;;  %p1300_p0 = scmp.ne.s32.totalorder %s1139_s14, %s1299_s2  ;;  %p1305_p2 = scmp.lt.s32.totalorder %s1299_s2, %s1299_s2 }
 0x1ba   :  { %v956_v55 = vrot.slane %v942_v63, %v1778_v16  ;;  %v965_v7 = vrot.slane %v958_v0, %v1778_v16 }
 0x1bb   :  { %v877_v8 = vrot.slane %v863_v1, %v1778_v16  ;;  %v878_v9 = vcombine.high %v870_v2, %v870_v2  ;;  %v910_v10 = vmax.f32 %v870_v2, 0.0  ;;  %v886_v14 = vrot.slane %v822_v3, %v1778_v16  ;;  %p1306_p3 = por %p1305_p2, %p1304_p1 }
 0x1bc   :  { %v957_v11 = vcombine.low %v949_v4, %v956_v55  ;;  %v973_v17 = vcombine.low %v965_v7, %v972_v5 }
 0x1bd   :  { %v879_v18 = vcombine.high %v877_v8, %v877_v8  ;;  %v911_v19 = vmax.f32 %v878_v9, 0.0  ;;  %v912_v20 = vmax.f32 %v877_v8, 0.0  ;;  %v974_v21 = vcombine.low %v909_v12, %v910_v10  ;;  %p1307_p4 = pnand %p1306_p3, %p1300_p0 }
 0x1be   :  { %v887_v23 = vcombine.high %v886_v14, %v886_v14  ;;  %v914_v24 = vmax.f32 %v886_v14, 0.0  ;;  %v1011_v25 = vsel %vm1798_vm11, %v957_v11, 0.0  ;;  %v1012_v28 = vsel %vm1805_vm2, %v973_v17, 0.0 }
 0x1bf   :  { %v913_v26 = vmax.f32 %v879_v18, 0.0  ;;  %v975_v27 = vcombine.low %v911_v19, %v912_v20  ;;  %v1016_v29 = vsel %vm1015_vm10, %v1011_v25, -inf  ;;  %v1018_v31 = vsel %vm1017_vm8, %v1012_v28, -inf }
 0x1c0   :  { %v915_v30 = vmax.f32 %v887_v23, 0.0  ;;  %v982_v32 = vrot.slane %v974_v21, %v1778_v16  ;;  %v1019_v35 = vmax.f32 %v1016_v29, %v1018_v31 }
 0x1c1   :  { %v991_v33 = vcombine.low %v913_v26, %v914_v24  ;;  %v989_v34 = vrot.slane %v975_v27, %v1778_v16 }
 0x1c2   :  { %v1005_v38 = vrot.slane %v915_v30, %v1778_v16  ;;  %v1020_v42 = vrot.slane %v1019_v35, 4 }
 0x1c3   :  { %v998_v37 = vrot.slane %v991_v33, %v1778_v16  ;;  %v990_v40 = vcombine.low %v982_v32, %v989_v34 }
 0x1c4   :  { %v1021_v45 = vmax.f32 %v1019_v35, %v1020_v42 }
 0x1c5   :  { %v1006_v43 = vcombine.low %v998_v37, %v1005_v38  ;;  %v1013_v44 = vsel %vm1798_vm11, %v990_v40, 0.0 }
 0x1c6   :  { %v1026_v47 = vsel %vm1015_vm10, %v1013_v44, -inf  ;;  %v1022_v49 = vrot.slane %v1021_v45, 2 }
 0x1c7   :  { %v1014_v46 = vsel %vm1805_vm2, %v1006_v43, 0.0 }
 0x1c8   :  { %v1027_v48 = vsel %vm1017_vm8, %v1014_v46, -inf  ;;  %v1023_v52 = vmax.f32 %v1021_v45, %v1022_v49 }
 0x1c9   :  { %v1028_v50 = vmax.f32 %v1026_v47, %v1027_v48 }
 0x1ca   :  { %v1024_v54 = vrot.slane %v1023_v52, 1 }
 0x1cb   :  { %v1029_v51 = vrot.slane %v1028_v50, 4 }
 0x1cc   :  { %v1025_v39 = vmax.f32 %v1023_v52, %v1024_v54 }
 0x1cd   :  { %v1030_v53 = vmax.f32 %v1028_v50, %v1029_v51 }
 0x1cf   :  { %v1031_v16 = vrot.slane %v1030_v53, 2 }
 0x1d1   :  { %v1032_v36 = vmax.f32 %v1030_v53, %v1031_v16 }
 0x1d3   :  { %v1033_v22 = vrot.slane %v1032_v36, 1 }
 0x1d5   :  { %v1034_v41 = vmax.f32 %v1032_v36, %v1033_v22 }
 0x1d7   :  { %v1046_v56 = vsel %vm1045_vm15, %v1034_v41, %v1025_v39 }
 0x1d8   :  { %1246 = vmatmul.mubr.msk.f32.vlgmr.msra.gmra.mrb[4].mxu1 %vm1015_vm10, %v1046_v56 }
 0x2ab   :  { %v1115_v58 = vpop.f32.mrb[4].mxu1 }
 0x2ac   :  { %v1116_v59 = vadd.f32 %v1187_v57, %v1115_v58  ;;  %v1247_v60 = vpop.f32.mrb[5].mxu1 }
 0x2ae   :  { %v1120_v61 = vsel %vm1119_vm9, %v1116_v59, -inf }
 0x2af   :  { %1121 = vmax.xlane.f32.xlu0 %v1120_v61 }
 0x33c   :  { %v1122_v62 = vpop.xlane.xlu0 %1121 }
 0x33d   :  { %v1123_v63 = vsub.f32 %v1116_v59, %v1122_v62 }
 0x33f   :  { %v1124_v13 = vmul.f32 1.442695, %v1123_v63 }
 0x341   :  { %1295 = vpow2.f32 %v1124_v13 }
 0x34b   :  { %v1296_v0 = vpop.eup %1295 }
 0x34c   :  { %v1126_v1 = vsel %vm1119_vm9, %v1296_v0, 0.0 }
 0x34d   :  { %1127 = vadd.xlane.f32.xlu1 %v1126_v1 }
 0x3da   :  { %v1128_v2 = vpop.xlane.xlu1 %1127 }
 0x3db   :  { %1297 = vrcp.f32 %v1128_v2 }
 0x3e5   :  { %v1298_v3 = vpop.eup %1297 }
 0x3e6   :  { %v1130_v4 = vmul.f32 %v1298_v3, %v1296_v0 }
 0x3e8   :  { %1131 = vst.msk [vmem:[#allocation2] sm:$0x3] %vm1119_vm9, %v1130_v4 }
 0x3e9   :  { %1310 = shalt.err (!%p1307_p4)
}
 0x3ea   :  { %s1311_s17 = scalar_lea.hbm %s1847_s3, 32 }
 0x3eb   :  { %p1312_p5 = scmp.ne.s32.totalorder %s1847_s3, %s1311_s17  ;;  %p1315_p6 = scmp.lt.u32.totalorder %s1311_s17, %s1847_s3 }
 0x3ed   :  { %p1317_p7 = pnand %p1315_p6, %p1312_p5 }
 0x3ef   :  { %1320 = shalt.err (!%p1317_p7)
}
 0x3f0   :  { %1141 = dma.vmem_to_hbm [thread:$0]  %s1139_s14, 32, %s1847_s3, [#allocation3]  }
 0x3f1   :  { %1321 = dma.done.wait [#allocation3], 32  }
 0x3f2   :  { %1322 = vsyncadd [#allocation3], 4294967264 }
 0x3f3   :  { %1145 = vsyncpa [#allocation3], 1 }

</bundles_post_ra>
